<compile_context>
chip_gen: v7x
topology: tpu7x:2x2x1
jax: 0.10.0
libtpu: 0.0.40
codegen_flags: <defaults>
</compile_context>

<pallas_src>
import functools

import jax
import jax.numpy as jnp
from jax import lax
from jax.experimental import pallas as pl
from jax.experimental.pallas import tpu as pltpu

_CLAMP_MIN = 1e-12
_CLAMP_MAX = 1e12


# ---------------------------------------------------------------------------
# Path A: label-gather.  Only the B label rows of `centers` are read from HBM.
# ---------------------------------------------------------------------------
def _center_loss_gather_kernel(labels_ref, x_ref, centers_hbm, loss_ref,
                               gather_ref, sem_ref, *, batch_size, num_classes):
    # Issue all row-gather DMAs first (all in flight), then wait, then compute.
    def _start(i, carry):
        pltpu.make_async_copy(
            centers_hbm.at[pl.ds(labels_ref[i], 1), :],
            gather_ref.at[pl.ds(i, 1), :],
            sem_ref.at[i],
        ).start()
        return carry

    lax.fori_loop(0, batch_size, _start, 0)

    def _wait(i, carry):
        pltpu.make_async_copy(
            centers_hbm.at[pl.ds(labels_ref[i], 1), :],
            gather_ref.at[pl.ds(i, 1), :],
            sem_ref.at[i],
        ).wait()
        return carry

    lax.fori_loop(0, batch_size, _wait, 0)

    xf = x_ref[...].astype(jnp.float32)
    cf = gather_ref[...].astype(jnp.float32)
    diff = xf - cf
    d = jnp.sum(diff * diff, axis=1, keepdims=True)              # [B, 1]
    d = jnp.clip(d, _CLAMP_MIN, _CLAMP_MAX)                      # on-label clamp
    off_label = jnp.float32(_CLAMP_MIN * batch_size * (num_classes - 1))
    loss_ref[0] = (jnp.sum(d) + off_label) / jnp.float32(batch_size)


def _center_loss_gather(x, labels, centers):
    b, f = x.shape
    c, _ = centers.shape
    kernel = functools.partial(_center_loss_gather_kernel,
                               batch_size=b, num_classes=c)
    out = pl.pallas_call(
        kernel,
        out_shape=jax.ShapeDtypeStruct((1,), jnp.float32),
        grid_spec=pltpu.PrefetchScalarGridSpec(
            num_scalar_prefetch=1,                               # labels -> SMEM
            grid=(1,),
            in_specs=[
                pl.BlockSpec((b, f), lambda i, lbl_ref: (0, 0)),  # x resident in VMEM
                pl.BlockSpec(memory_space=pl.ANY),                # centers stay in HBM
            ],
            out_specs=pl.BlockSpec(memory_space=pltpu.SMEM),
            scratch_shapes=[
                pltpu.VMEM((b, f), centers.dtype),                # gathered label centers
                pltpu.SemaphoreType.DMA((b,)),                    # one sem per row DMA
            ],
        ),
        compiler_params=pltpu.CompilerParams(
            dimension_semantics=("arbitrary",)),
    )(labels.astype(jnp.int32), x, centers)
    return out[0]


# ---------------------------------------------------------------------------
# Path B: class-tiled streaming matmul (only worthwhile when C is within a
# small factor of B).
# ---------------------------------------------------------------------------
def _center_loss_stream_kernel(x_ref, centers_ref, labels_ref, loss_ref,
                               x2_ref, acc_ref, *, batch_size, num_classes,
                               class_tile):
    j = pl.program_id(0)

    @pl.when(j == 0)
    def _init():
        xf = x_ref[...].astype(jnp.float32)
        x2_ref[...] = jnp.sum(xf * xf, axis=1, keepdims=True)    # hoisted ||x||^2
        acc_ref[...] = jnp.zeros_like(acc_ref)

    x = x_ref[...]          # [B, F]   native dtype
    c = centers_ref[...]    # [tc, F]  native dtype

    # x @ centers_tile.T on the MXU without materializing the transpose.
    xc = lax.dot_general(x, c, (((1,), (1,)), ((), ())),
                         preferred_element_type=jnp.float32)     # [B, tc]

    # Row of squared center norms as lane-major [1, tc] via a tiny MXU
    # contraction (avoids a sublane->lane relayout of a reduce result).
    cf = c.astype(jnp.float32)
    ones_row = jnp.ones((1, cf.shape[1]), dtype=jnp.float32)
    c2 = lax.dot_general(ones_row, cf * cf, (((1,), (1,)), ((), ())),
                         preferred_element_type=jnp.float32)     # [1, tc]

    distmat = (x2_ref[...] - 2.0 * xc) + c2                      # [B, tc]

    # Label mask: shift labels by the tile offset ([B,1] op) and compare with
    # the tile-local column iota (no full [B,tc] integer add per step).
    col = lax.broadcasted_iota(jnp.int32, distmat.shape, 1)
    mask = (labels_ref[...] - j * class_tile) == col             # [B, tc]

    # Unclamped per-row accumulation; each row's label hits exactly one tile.
    acc_ref[...] += jnp.sum(jnp.where(mask, distmat, 0.0), axis=1, keepdims=True)

    @pl.when(j == pl.num_programs(0) - 1)
    def _finalize():
        per_row = jnp.clip(acc_ref[...], _CLAMP_MIN, _CLAMP_MAX)  # clamp once/row
        off_label = jnp.float32(_CLAMP_MIN * batch_size * (num_classes - 1))
        loss_ref[0] = (jnp.sum(per_row) + off_label) / jnp.float32(batch_size)


def _center_loss_stream(x, labels, centers, *, class_tile=None):
    b, f = x.shape
    c, _ = centers.shape

    if class_tile is None:
        class_tile = c if c <= 512 else 512
    num_tiles = pl.cdiv(c, class_tile)
    c_pad = num_tiles * class_tile
    if c_pad != c:
        # Padded classes never match any label; the off-label constant inside
        # the kernel uses the true (unpadded) class count.
        centers = jnp.pad(centers, ((0, c_pad - c), (0, 0)))

    labels2d = labels.reshape(b, 1).astype(jnp.int32)

    kernel = functools.partial(_center_loss_stream_kernel,
                               batch_size=b, num_classes=c,
                               class_tile=class_tile)

    out = pl.pallas_call(
        kernel,
        out_shape=jax.ShapeDtypeStruct((1,), jnp.float32),
        grid_spec=pltpu.PrefetchScalarGridSpec(
            num_scalar_prefetch=0,
            grid=(num_tiles,),
            in_specs=[
                pl.BlockSpec((b, f), lambda j: (0, 0)),            # x (resident)
                pl.BlockSpec((class_tile, f), lambda j: (j, 0)),   # centers tile (pipelined)
                pl.BlockSpec((b, 1), lambda j: (0, 0)),            # labels (resident)
            ],
            out_specs=pl.BlockSpec(memory_space=pltpu.SMEM),
            scratch_shapes=[
                pltpu.VMEM((b, 1), jnp.float32),                   # hoisted ||x||^2
                pltpu.VMEM((b, 1), jnp.float32),                   # per-row accumulator
            ],
        ),
        compiler_params=pltpu.CompilerParams(
            dimension_semantics=("arbitrary",)),
    )(x, centers, labels2d)
    return out[0]


# ---------------------------------------------------------------------------
# Public entry point.
# ---------------------------------------------------------------------------
def center_loss(x, labels, centers, *, class_tile=None, force_path=None):
    """CenterLoss forward.  `centers` is the module's learned parameter.

    Dispatch: when num_classes is much larger than batch_size only the B label
    rows of `centers` are ever selected by the mask, so the DMA-gather kernel
    is used; otherwise the class-tiled streaming-matmul kernel is used.
    """
    b, f = x.shape
    c, f2 = centers.shape
    assert f == f2, (x.shape, centers.shape)
    assert labels.shape == (b,), labels.shape

    if force_path == "gather":
        use_gather = True
    elif force_path == "stream":
        use_gather = False
    else:
        use_gather = c > 4 * b

    if use_gather:
        return _center_loss_gather(x, labels, centers)
    return _center_loss_stream(x, labels, centers, class_tile=class_tile)


def _reference_loss(x, labels, centers, *, exact=False):
    # Plain-JAX mirror of the PyTorch CenterLoss.forward.
    b = x.shape[0]
    c = centers.shape[0]
    if exact:
        distmat = jnp.sum((x[:, None, :] - centers[None, :, :]) ** 2, axis=-1)
    else:
        distmat = (jnp.sum(x ** 2, axis=1, keepdims=True)
                   + jnp.sum(centers ** 2, axis=1)[None, :]
                   - 2.0 * (x @ centers.T))
    mask = labels[:, None] == jnp.arange(c)[None, :]
    dist = distmat * mask.astype(distmat.dtype)
    return jnp.clip(dist, _CLAMP_MIN, _CLAMP_MAX).sum() / b


if __name__ == "__main__":
    key = jax.random.PRNGKey(0)
    kx, kc, kl = jax.random.split(key, 3)

    # Small shapes consistent with the module: batch=8, feat_dim=32, classes=16.
    B, F, C = 8, 32, 16
    x = jax.random.normal(kx, (B, F), dtype=jnp.float32)
    centers = jax.random.normal(kc, (C, F), dtype=jnp.float32)   # nn.Parameter analogue
    labels = jax.random.randint(kl, (B,), 0, C, dtype=jnp.int32)

    # Streaming-matmul path (class_tile=8 -> grid=(2,) exercises accumulation).
    loss_stream = center_loss(x, labels, centers, class_tile=8, force_path="stream")
    jax.block_until_ready(loss_stream)

    # Label-gather path (the default whenever num_classes >> batch).
    loss_gather = center_loss(x, labels, centers, force_path="gather")
    jax.block_until_ready(loss_gather)

    # The streaming path uses the MXU like XLA's matmul-based reference; the
    # gather path is exact f32 VPU math, so compare it against the
    # elementwise-exact reference.
    ref_mm = _reference_loss(x, labels, centers, exact=False)
    ref_ex = _reference_loss(x, labels, centers, exact=True)

    assert jnp.allclose(loss_stream, ref_mm, rtol=1e-4, atol=1e-3), (loss_stream, ref_mm)
    assert jnp.allclose(loss_gather, ref_ex, rtol=1e-4, atol=1e-3), (loss_gather, ref_ex)

    print("KERNEL_OK")
</pallas_src>

<mosaic_0001>
module attributes {stable_mosaic.version = 11 : i64} {
  func.func @_center_loss_stream_kernel(%arg0: i32, %arg1: memref<8x32xf32, #tpu.memory_space<vmem>>, %arg2: memref<8x32xf32, #tpu.memory_space<vmem>>, %arg3: memref<8x1xi32, #tpu.memory_space<vmem>>, %arg4: memref<1xf32, #tpu.memory_space<smem>>, %arg5: memref<8x1xf32, #tpu.memory_space<vmem>>, %arg6: memref<8x1xf32, #tpu.memory_space<vmem>>) attributes {dimension_semantics = [#tpu.dimension_semantics<arbitrary>], iteration_bounds = array<i64: 2>, scalar_prefetch = 0 : i64, scratch_operands = 2 : i64, tpu.core_type = #tpu.core_type<tc>, window_params = [{pipeline_mode = #tpu.pipeline_mode<synchronous>, transform_indices = @transform_0, window_bounds = array<i64: 8, 32>}, {transform_indices = @transform_1, window_bounds = array<i64: 8, 32>}, {pipeline_mode = #tpu.pipeline_mode<synchronous>, transform_indices = @transform_2, window_bounds = array<i64: 8, 1>}, {transform_indices = @transform_3, window_bounds = array<i64: 1>}]} {
    %c0_i32 = arith.constant 0 : i32
    %0 = arith.cmpi eq, %arg0, %c0_i32 : i32
    %1 = arith.extui %0 : i1 to i32
    %c0_i32_0 = arith.constant 0 : i32
    %2 = arith.cmpi ne, %1, %c0_i32_0 : i32
    scf.if %2 {
      %c0_18 = arith.constant 0 : index
      %c0_19 = arith.constant 0 : index
      %33 = vector.load %arg1[%c0_18, %c0_19] : memref<8x32xf32, #tpu.memory_space<vmem>>, vector<8x32xf32>
      %34 = arith.mulf %33, %33 : vector<8x32xf32>
      %cst_20 = arith.constant dense<0.000000e+00> : vector<8xf32>
      %35 = vector.multi_reduction <add>, %34, %cst_20 [1] : vector<8x32xf32> to vector<8xf32>
      %36 = vector.shape_cast %35 : vector<8xf32> to vector<8x1xf32>
      %c0_21 = arith.constant 0 : index
      %c0_22 = arith.constant 0 : index
      %37 = vector.load %arg5[%c0_21, %c0_22] : memref<8x1xf32, #tpu.memory_space<vmem>>, vector<8x1xf32>
      tpu.vector_store %arg5[%c0_21, %c0_22], %36 {strides = array<i32>} : memref<8x1xf32, #tpu.memory_space<vmem>>, vector<8x1xf32>,
      %cst_23 = arith.constant 0.000000e+00 : f32
      %38 = vector.broadcast %cst_23 : f32 to vector<8x1xf32>
      %c0_24 = arith.constant 0 : index
      %c0_25 = arith.constant 0 : index
      %39 = vector.load %arg6[%c0_24, %c0_25] : memref<8x1xf32, #tpu.memory_space<vmem>>, vector<8x1xf32>
      tpu.vector_store %arg6[%c0_24, %c0_25], %38 {strides = array<i32>} : memref<8x1xf32, #tpu.memory_space<vmem>>, vector<8x1xf32>,
    } else {
    }
    %c0 = arith.constant 0 : index
    %c0_1 = arith.constant 0 : index
    %3 = vector.load %arg1[%c0, %c0_1] : memref<8x32xf32, #tpu.memory_space<vmem>>, vector<8x32xf32>
    %c0_2 = arith.constant 0 : index
    %c0_3 = arith.constant 0 : index
    %4 = vector.load %arg2[%c0_2, %c0_3] : memref<8x32xf32, #tpu.memory_space<vmem>>, vector<8x32xf32>
    %cst = arith.constant dense<0.000000e+00> : vector<8x8xf32>
    %5 = tpu.matmul %3, %4, %cst {dimension_numbers = #tpu.dot_dimension_numbers<[1], [1], [0], [0], [0, 0, 1, 0], [], []>} : vector<8x32xf32>, vector<8x32xf32>, vector<8x8xf32> -> vector<8x8xf32>
    %cst_4 = arith.constant 1.000000e+00 : f32
    %6 = vector.broadcast %cst_4 : f32 to vector<1x32xf32>
    %7 = arith.mulf %4, %4 : vector<8x32xf32>
    %cst_5 = arith.constant dense<0.000000e+00> : vector<1x8xf32>
    %8 = tpu.matmul %6, %7, %cst_5 {dimension_numbers = #tpu.dot_dimension_numbers<[1], [1], [0], [0], [0, 0, 1, 0], [], []>} : vector<1x32xf32>, vector<8x32xf32>, vector<1x8xf32> -> vector<1x8xf32>
    %c0_6 = arith.constant 0 : index
    %c0_7 = arith.constant 0 : index
    %9 = vector.load %arg5[%c0_6, %c0_7] : memref<8x1xf32, #tpu.memory_space<vmem>>, vector<8x1xf32>
    %cst_8 = arith.constant 2.000000e+00 : f32
    %10 = vector.broadcast %cst_8 : f32 to vector<8x8xf32>
    %11 = arith.mulf %10, %5 : vector<8x8xf32>
    %12 = vector.broadcast %9 : vector<8x1xf32> to vector<8x8xf32>
    %13 = arith.subf %12, %11 : vector<8x8xf32>
    %14 = vector.broadcast %8 : vector<1x8xf32> to vector<8x8xf32>
    %15 = arith.addf %13, %14 : vector<8x8xf32>
    %16 = tpu.iota {dimensions = array<i32: 1>} : vector<8x8xi32>
    %c0_9 = arith.constant 0 : index
    %c0_10 = arith.constant 0 : index
    %17 = vector.load %arg3[%c0_9, %c0_10] : memref<8x1xi32, #tpu.memory_space<vmem>>, vector<8x1xi32>
    %c8_i32 = arith.constant 8 : i32
    %18 = arith.muli %arg0, %c8_i32 : i32
    %19 = vector.broadcast %18 : i32 to vector<8x1xi32>
    %20 = arith.subi %17, %19 : vector<8x1xi32>
    %21 = vector.broadcast %20 : vector<8x1xi32> to vector<8x8xi32>
    %22 = arith.cmpi eq, %21, %16 : vector<8x8xi32>
    %c0_11 = arith.constant 0 : index
    %c0_12 = arith.constant 0 : index
    %23 = vector.load %arg6[%c0_11, %c0_12] : memref<8x1xf32, #tpu.memory_space<vmem>>, vector<8x1xf32>
    %cst_13 = arith.constant 0.000000e+00 : f32
    %24 = vector.broadcast %cst_13 : f32 to vector<8x8xf32>
    %25 = arith.select %22, %15, %24 : vector<8x8xi1>, vector<8x8xf32>
    %cst_14 = arith.constant dense<0.000000e+00> : vector<8xf32>
    %26 = vector.multi_reduction <add>, %25, %cst_14 [1] : vector<8x8xf32> to vector<8xf32>
    %27 = vector.shape_cast %26 : vector<8xf32> to vector<8x1xf32>
    %28 = arith.addf %23, %27 : vector<8x1xf32>
    %c0_15 = arith.constant 0 : index
    %c0_16 = arith.constant 0 : index
    %29 = vector.load %arg6[%c0_15, %c0_16] : memref<8x1xf32, #tpu.memory_space<vmem>>, vector<8x1xf32>
    tpu.vector_store %arg6[%c0_15, %c0_16], %28 {strides = array<i32>} : memref<8x1xf32, #tpu.memory_space<vmem>>, vector<8x1xf32>,
    %c1_i32 = arith.constant 1 : i32
    %30 = arith.cmpi eq, %arg0, %c1_i32 : i32
    %31 = arith.extui %30 : i1 to i32
    %c0_i32_17 = arith.constant 0 : i32
    %32 = arith.cmpi ne, %31, %c0_i32_17 : i32
    scf.if %32 {
      %c0_18 = arith.constant 0 : index
      %c0_19 = arith.constant 0 : index
      %33 = vector.load %arg6[%c0_18, %c0_19] : memref<8x1xf32, #tpu.memory_space<vmem>>, vector<8x1xf32>
      %cst_20 = arith.constant 9.99999996E-13 : f32
      %cst_21 = arith.constant 9.99999995E+11 : f32
      %34 = vector.broadcast %cst_20 : f32 to vector<8x1xf32>
      %35 = arith.maximumf %34, %33 : vector<8x1xf32>
      %36 = vector.broadcast %cst_21 : f32 to vector<8x1xf32>
      %37 = arith.minimumf %36, %35 : vector<8x1xf32>
      %38 = vector.shape_cast %37 : vector<8x1xf32> to vector<1x8x1xf32>
      %cst_22 = arith.constant dense<0.000000e+00> : vector<1xf32>
      %39 = vector.multi_reduction <add>, %38, %cst_22 [1, 2] : vector<1x8x1xf32> to vector<1xf32>
      %40 = vector.shape_cast %39 : vector<1xf32> to vector<1x1x1xf32>
      %41 = vector.extract %40[0, 0, 0] : f32 from vector<1x1x1xf32>
      %cst_23 = arith.constant 1.200000e-10 : f32
      %42 = arith.addf %41, %cst_23 : f32
      %cst_24 = arith.constant 8.000000e+00 : f32
      %43 = arith.divf %42, %cst_24 : f32
      %c0_25 = arith.constant 0 : index
      %44 = memref.load %arg4[%c0_25] : memref<1xf32, #tpu.memory_space<smem>>
      memref.store %43, %arg4[%c0_25] : memref<1xf32, #tpu.memory_space<smem>>
    } else {
    }
    return
  }
  func.func @transform_0(%arg0: i32) -> (i32, i32) {
    %c0_i32 = arith.constant 0 : i32
    %c0_i32_0 = arith.constant 0 : i32
    %c0_i32_1 = arith.constant 0 : i32
    return %c0_i32, %c0_i32_0 : i32, i32
  }
  func.func @transform_1(%arg0: i32) -> (i32, i32) {
    %c0_i32 = arith.constant 0 : i32
    %c0_i32_0 = arith.constant 0 : i32
    return %arg0, %c0_i32 : i32, i32
  }
  func.func @transform_2(%arg0: i32) -> (i32, i32) {
    %c0_i32 = arith.constant 0 : i32
    %c0_i32_0 = arith.constant 0 : i32
    %c0_i32_1 = arith.constant 0 : i32
    return %c0_i32, %c0_i32_0 : i32, i32
  }
  func.func @transform_3(%arg0: i32) -> i32 {
    %c0_i32 = arith.constant 0 : i32
    %c0_i32_0 = arith.constant 0 : i32
    return %c0_i32 : i32
  }
}

</mosaic_0001>

<bundles_post_ra>
// kernel: tpu_custom_call.1
= control target key start
LH: loop header
LB: loop body
LE: loop exit
PB: predicated region body
PF: predicated region fallthrough
CT: control target
= control target key end

     0   :  { %8 = vsyncpa [#allocation5], 0  ;;  %s780_s0 = inlined_call_operand.vmem [shape: f32[8,32], index: 0, kind: input, shape index: {}]   ;;  %s781_s1 = inlined_call_operand.hbm [shape: f32[16,32], index: 1, kind: input, shape index: {}]   ;;  %s782_s2 = inlined_call_operand.vmem [shape: s32[8,1], index: 2, kind: input, shape index: {}]   ;;  %s783_s3 = inlined_call_operand.hbm [shape: f32[1], index: 3, kind: output, shape index: {}]  }
   0x1   :  { %10 = vsyncpa [#allocation5 + $0x1], 0 }
   0x2   :  { %11 = vsyncpa [#allocation6], 0  ;;  %s649_s12 = smov 0   ;;  %s651_s13 = smov 0  }
   0x3   :  { %s653_s14 = smov 0   ;;  %s655_s15 = smov 0  }
   0x4 LB: > { %s668_s16 = sadd.s32 4294967295, %s620_s15   ;;  %s671_s17 = sadd.s32 1, %s620_s15   ;;  %s620_s15 = sphi %s655_s15, %s791_s15   ;;  %s616_s14 = sphi %s653_s14, %s790_s14   ;;  %s612_s13 = sphi %s651_s13, %s789_s13   ;;  %s608_s12 = sphi %s649_s12, %s788_s12  }
   0x5   : > { %s42_s18 = ssub.s32 %s620_s15, %s671_s17  ;;  %s45_s19 = sadd.s32 1, %s616_s14 }
   0x6   : > { %p43_p0 = scmp.eq.s32.totalorder %s42_s18, 0  ;;  %p52_p1 = scmp.ne.s32.totalorder %s616_s14, %s612_s13 }
   0x7   : > { %p53_p2 = scmp.eq.s32.totalorder %s620_s15, 0  ;;  %p58_p3 = scmp.ne.s32.totalorder %s612_s13, %s608_s12 }
   0x8   : > { %s681_s20 = scalar_select %p43_p0, %s616_s14, %s45_s19  }
   0x9   : > { %p54_p4 = por %p53_p2, %p52_p1  ;;  %p59_p5 = scmp.eq.s32.totalorder %s668_s16, 0 }
   0xa   : > { %p498_p6 = scmp.lt.s32.totalorder %s620_s15, 2  ;;  %s130_s22 = sand.u32 1, %s616_s14  }
   0xb   : > { %p685_p7 = por %p59_p5, %p58_p3  ;;  %s457_s23 = sshll.u32 %s130_s22, 3 }
   0xc   : > { %s458_s24 = sshll.u32 %s620_s15, 7  ;;  %s134_s28 = scalar_lea.vmem [#allocation4], %s457_s23 }
   0xd   : > { %s694_s27 = scalar_lea.hbm %s781_s1, %s458_s24  ;;  %s141_s29 = sshll.u32 %s134_s28, 4  ;;  %s696_s29 = int_to_ptr.vmem [resolvable:$true] %s141_s29 }
   0xe   : > { %p698_p8 = pnand %p498_p6, %p54_p4  ;;  %s131_s4 = scalar_lea.sflag [#allocation5], %s130_s22 }
   0xf   : > { %s540_s5 = scalar_lea.hbm %s694_s27, 128  ;;  %s545_s8 = scalar_lea.hbm %s781_s1, 256 }
  0x10   : > { %p541_p11 = scmp.ne.s32.totalorder %s694_s27, %s540_s5  ;;  %p542_p12 = pneg %p698_p8 }
  0x11   : > { %p546_p1 = scmp.lt.u32.totalorder %s694_s27, %s781_s1  ;;  %p547_p2 = scmp.lt.u32.totalorder %s545_s8, %s540_s5 }
  0x12   : > { %p543_p13 = pnand %p542_p12, %p541_p11  ;;  %p549_p4 = scmp.lt.u32.totalorder %s540_s5, %s694_s27 }
  0x13   : > { %p548_p3 = por %p547_p2, %p546_p1 }
  0x14   : > { %p544_p0 = pneg %p543_p13 }
  0x15   : > { %p550_p5 = por %p549_p4, %p548_p3 }
  0x17   : > { %p551_p6 = pnand %p550_p5, %p544_p0 }
  0x19   : > { %554 = shalt.err (!%p551_p6)
}
  0x1a   : > { %s555_s11 = scalar_lea.vmem %s696_s29, 128  ;;  %s622_s12 = smov [#allocation4]  }
  0x1b   : > { %p556_p11 = scmp.ne.s32.totalorder %s696_s29, %s555_s11  ;;  %s560_s18 = sshll.u32 %s622_s12, 4  ;;  %s561_s18 = int_to_ptr.vmem [resolvable:$false] %s560_s18 }
  0x1c   : > { %s562_s19 = scalar_lea.vmem %s561_s18, 256  ;;  %p563_p10 = scmp.lt.s32.totalorder %s696_s29, %s561_s18 }
  0x1d   : > { %p558_p13 = pnand %p556_p11, %p542_p12  ;;  %p564_p1 = scmp.lt.s32.totalorder %s562_s19, %s555_s11 }
  0x1f   : > { %p559_p9 = pneg %p558_p13  ;;  %p565_p2 = por %p564_p1, %p563_p10 }
  0x21   : > { %p566_p3 = pnand %p565_p2, %p559_p9 }
  0x23   : > { %569 = shalt.err (!%p566_p3)
}
  0x24   : > { %497 = dma.hbm_to_vmem [thread:$0]  (!%p698_p8), %s694_s27, 128, %s696_s29, %s131_s4  }
  0x25   : > { %p786_p0 = scmp.lt.s32.totalorder %s620_s15, 3  ;;  %p787_p4 = scmp.ge.s32.totalorder %s620_s15, 1 }
  0x27   : > { %p147_p12 = pnand %p787_p4, %p786_p0 }
  0x28   : > { %s152_s22 = sand.u32 (!%p147_p12), 1, %s612_s13  }
  0x29   : > { %150 = sbr.rel (%p147_p12) target bundleno = 803 (0x323), region = 32  ;;  %s460_s23 = sshll.u32 (!%p147_p12), %s152_s22, 3 }
  0x2a   : > { %s153_s24 = scalar_lea.sflag (!%p147_p12), [#allocation5], %s152_s22  ;;  %s156_s25 = scalar_lea.vmem (!%p147_p12), [#allocation4], %s460_s23 }
  0x30   : > { %599 = dma.done.wait (%p685_p7), %s153_s24, 128  }
  0x31   : > { %601 = vsyncadd (%p685_p7), %s153_s24, 4294967168  ;;  %p461_p9 = scmp.ne.s32.totalorder %s668_s16, 0 }
  0x32   : > { %v178_v0 = vld [vmem:[%s780_s0] sm:$0xff] (!%p461_p9)  ;;  %vm180_vm0 = vcmask (!%p461_p9), 261120   ;;  %vm184_vm1 = vcmask (!%p461_p9), 7168   ;;  %v623_v3 = vmov (!%p461_p9), 0.0  }
  0x33   : > { %177 = sbr.rel (%p461_p9) target bundleno = 197 (0xc5), region = 40  ;;  %v179_v1 = vmul.f32 (!%p461_p9), %v178_v0, %v178_v0  ;;  %186 = vst.msk [vmem:[#allocation3] sm:$0xff] (!%p461_p9), %vm184_vm1, %v623_v3 }
  0x35   : > { %v181_v2 = vsel (!%p461_p9), %vm180_vm0, %v179_v1, 0.0 }
  0x36   : > { %182 = vadd.xlane.f32.xlu0 (!%p461_p9), %v181_v2 }
  0xc3   : > { %v183_v4 = vpop.xlane.xlu0 %182 }
  0xc4   : > { %185 = vst.msk [vmem:[#allocation2] sm:$0xff] %vm184_vm1, %v183_v4 }
  0xc5 PF: > { %v188_v5 = vld [vmem:[%s156_s25] sm:$0xff]  ;;  %vm189_vm2 = vcmask 261120   ;;  %v624_v6 = vmov 0.0   ;;  %s466_s15 = sshll.u32 %s668_s16, 3  ;;  %vm625_vm3 = vmmov 0   ;;  %v187_v8 = vld [vmem:[%s780_s0] sm:$0xff]  ;;  %v351_v15 = vlaneseq }
  0xc6   : > { %476 = vmatprep.subr.mxu0 %v624_v6  ;;  %v266_v7 = vmul.f32 %v188_v5, %v188_v5  ;;  %481 = vmatprep.subr.mxu1 %v624_v6  ;;  %v358_v10 = vld [vmem:[%s782_s2] sm:$0xff]  ;;  %v360_v11 = vstv %s466_s15  ;;  %v626_v12 = vmov 0   ;;  %v627_v14 = vmov 1.0   ;;  %v366_v31 = vld [vmem:[#allocation3] sm:$0xff]  ;;  %p467_p7 = scmp.ne.s32.totalorder %s668_s16, 1 }
  0xc7   : > { %477 = vmatpush3.xpose.msk.msra.mxu0 %vm189_vm2, %v188_v5  ;;  %478 = vmatprep.mubr.msk.f32.mxu0 %vm625_vm3, %v624_v6  ;;  %v361_v13 = vsub.s32 %v358_v10, %v360_v11  ;;  %v352_v16 = vshrl.u32 %v351_v15, 7  ;;  %v357_v23 = vand.u32 127, %v351_v15  ;;  %vm368_vm4 = vcmask 64512  }
  0xc8   : > { %482 = vmatpush3.xpose.msk.msra.mxu1 %vm189_vm2, %v266_v7  ;;  %483 = vmatprep.mubr.msk.f32.mxu1 %vm625_vm3, %v624_v6  ;;  %vm373_vm6 = vcmask 7168  }
  0xc9   : > { %539 = vset.pattern.permute.xlu0 %v626_v12  ;;  %v353_v18 = vsub.s32 0, %v352_v16 }
  0xca   : > { %479 = vmatmul.mubr.msk.f32.vlgmr.msra.gmra.mrb[0].mxu0 %vm189_vm2, %v187_v8 }
  0xcb   : > { %v343_v9 = vld [vmem:[#allocation2] sm:$0xff]  ;;  %484 = vmatmul.mubr.msk.f32.vlgmr.msra.gmra.mrb[0].mxu1 %vm189_vm2, %v627_v14 }
  0xcc   : > { %347 = vperm.xlu0 %539, %v343_v9  }
  0xd0   : > { %363 = vperm.xlu0 %539, %v361_v13  }
 0x14b   : > { %v348_v17 = vpop.permute.xlu0 %347 }
 0x14f   : > { %v364_v27 = vpop.permute.xlu0 %363 }
 0x150   : > { %vm365_vm5 = vcmp.eq.s32.totalorder %v364_v27, %v357_v23 }
 0x19d   : > { %v262_v19 = vpop.f32.mrb[0].mxu0 }
 0x19e   : > { %v344_v20 = vmul.f32 2.0, %v262_v19  ;;  %v480_v21 = vpop.f32.mrb[1].mxu0  ;;  %v339_v22 = vpop.f32.mrb[0].mxu1 }
 0x19f   : > { %v354_v24 = vrot.slane %v339_v22, %v353_v18  ;;  %v485_v25 = vpop.f32.mrb[1].mxu1 }
 0x1a0   : > { %v350_v26 = vsub.f32 %v348_v17, %v344_v20 }
 0x1a2   : > { %v355_v28 = vadd.f32 %v354_v24, %v350_v26 }
 0x1a4   : > { %v367_v29 = vsel %vm365_vm5, %v355_v28, 0.0 }
 0x1a5   : > { %v369_v30 = vsel %vm368_vm4, %v367_v29, 0.0 }
 0x1a6   : > { %370 = vadd.xlane.f32.xlu1 %v369_v30 }
 0x230   : > { %378 = sbr.rel (%p467_p7) target bundleno = 788 (0x314), region = 44 }
 0x233   : > { %v371_v32 = vpop.xlane.xlu1 %370 }
 0x234   : > { %v372_v33 = vadd.f32 %v371_v32, %v366_v31 }
 0x236   : > { %374 = vst.msk [vmem:[#allocation3] sm:$0xff] %vm373_vm6, %v372_v33 }
 0x23d   : > { %v379_v34 = vld [vmem:[#allocation3] sm:$0xff] }
 0x23e   : > { %v380_v35 = vmax.f32 %v379_v34, 1e-12 }
 0x240   : > { %v381_v36 = vmin.f32 %v380_v35, 1e+12 }
 0x242   : > { %v382_v37 = vsel %vm373_vm6, %v381_v36, 0.0 }
 0x243   : > { %383 = vadd.xlane.f32.xlu0 %v382_v37 }
 0x2d0   : > { %v384_v38 = vpop.xlane.xlu0 %383 }
 0x2d1   : > { %v385_v39 = vrot.slane %v384_v38, 4 }
 0x2d3   : > { %v386_v40 = vadd.f32 %v385_v39, %v384_v38 }
 0x2d5   : > { %v387_v41 = vrot.slane %v386_v40, 2 }
 0x2d7   : > { %v388_v42 = vadd.f32 %v387_v41, %v386_v40 }
 0x2d9   : > { %v389_v43 = vrot.slane %v388_v42, 1 }
 0x2db   : > { %v390_v44 = vadd.f32 %v389_v43, %v388_v42 }
 0x2dd   : > { %486 = vpush %v390_v44 }
 0x30e   : > { %s487_s4 = spop %486 }
 0x30f   : > { %s392_s5 = sadd.f32 1.2e-10, %s487_s4 }
 0x311   : > { %s395_s6 = smul.f32 0.125, %s392_s5 }
 0x313   : > { %397 = sst [smem:[#allocation7]] %s395_s6 }
 0x314 PF: > { %p499_p8 = scmp.eq.s32.totalorder %s668_s16, 1  ;;  %s570_s9 = scalar_lea.hbm %s783_s3, 16 }
 0x315   : > { %p571_p10 = scmp.ne.s32.totalorder %s783_s3, %s570_s9  ;;  %p576_p11 = scmp.lt.u32.totalorder %s570_s9, %s783_s3 }
 0x317   : > { %p572_p5 = pnand %p571_p10, %p499_p8 }
 0x319   : > { %p573_p6 = pneg %p572_p5 }
 0x31b   : > { %p578_p13 = pnand %p576_p11, %p573_p6 }
 0x31d   : > { %581 = shalt.err (!%p578_p13)
}
 0x31e   : > { %s628_s19 = smov [#allocation7]  }
 0x31f   : > { %491 = dma.smem_to_hbm (%p499_p8), %s628_s19, 16, %s783_s3, [#allocation6]  }
 0x320   : > { %603 = dma.done.wait (%p499_p8), [#allocation6], 16  }
 0x321   : > { %605 = vsyncadd (%p499_p8), [#allocation6], 4294967280 }
 0x322   : > { %411 = sfence }
 0x323 PF: > { %p14_p1 = scmp.ge.s32.totalorder %s671_s17, 4   ;;  %s788_s12 = smov %s612_s13 }
 0x324   : > { %s789_s13 = smov %s616_s14  ;;  %s790_s14 = smov %s681_s20 }
 0x325   : > { %s791_s15 = smov %s671_s17  ;;  %16 = sbr.rel (!%p14_p1) target bundleno = 4 (0x4), region = 78 }
 0x32c   :  { %417 = vsyncpa [#allocation5], 1 }
 0x32d   :  { %419 = vsyncpa [#allocation5 + $0x1], 1 }
 0x32e   :  { %420 = vsyncpa [#allocation6], 1 }
 0x32f   :  { %422 = vsyncpa [#allocation6 + $0x1], 1 }

</bundles_post_ra>
